<compile_context>
chip_gen: v7x
topology: tpu7x:2x2x1
jax: 0.10.0
libtpu: 0.0.40
codegen_flags: <defaults>
</compile_context>

<pallas_src>
import math
import functools

import jax
import jax.numpy as jnp
from jax.experimental import pallas as pl
from jax.experimental.pallas import tpu as pltpu


def _exp_basis_kernel(dist_ref, means_ref, neg_betas_ref, out_ref, *, scale, offset):
    # dist_ref      : (TE, 1)  column of distances for this tile
    # means_ref     : (1, NB)  per-basis means (VMEM-resident across the grid)
    # neg_betas_ref : (1, NB)  per-basis -betas (VMEM-resident across the grid)
    # out_ref       : (TE, NB) output tile, already in the PyTorch (edge, rbf) layout
    y = jnp.exp(scale * dist_ref[...] + offset)            # (TE, 1): inner exp (EUP)
    d = y - means_ref[...]                                  # (TE, NB) via broadcast
    out_ref[...] = jnp.exp(neg_betas_ref[...] * d * d).astype(out_ref.dtype)


def _round_up(x, m):
    return ((x + m - 1) // m) * m


def _choose_tile_e(E, max_tile=4096, min_tile=8):
    # Target >=4 grid steps for large E (v7x megacore sharding), sublane-aligned,
    # capped so double-buffered blocks stay in the ~8-10 MiB range (fits the
    # scoped-VMEM default on every generation, including v7x's 64 MiB physical).
    t = _round_up(max(1, -(-E // 4)), 8)
    return int(max(min_tile, min(max_tile, t)))


def exp_basis(dist, means, betas, *, cutoff_lower=0.0, cutoff_upper=5.0, tile_e=None):
    """Pallas implementation of ExpBasis.forward.

    dist : arbitrary-shaped array of distances.
    means, betas : (num_rbf,) parameters (as in the PyTorch module).
    Returns an array of shape dist.shape + (num_rbf,), dtype == dist.dtype.
    """
    orig_shape = dist.shape
    out_dtype = dist.dtype
    flat = dist.reshape(-1).astype(jnp.float32)
    E = flat.shape[0]
    NB = means.shape[0]

    if E == 0:
        return jnp.zeros((*orig_shape, NB), dtype=out_dtype)

    # alpha * (cutoff_lower - dist)  ==  scale * dist + offset  (baked constants)
    alpha = 5.0 / (cutoff_upper - cutoff_lower)
    scale = -float(alpha)
    offset = float(alpha) * float(cutoff_lower)

    if tile_e is None:
        tile_e = _choose_tile_e(E)
    n_tiles = int(pl.cdiv(E, tile_e))
    E_pad = n_tiles * tile_e
    if E_pad != E:
        # Pad with the upper cutoff: padded rows stay finite (inner exp is tiny
        # there) and are sliced off below before anything else touches them.
        flat = jnp.pad(flat, (0, E_pad - E), constant_values=float(cutoff_upper))

    dist_col = flat.reshape(E_pad, 1)
    means_row = means.reshape(1, NB).astype(jnp.float32)
    neg_betas_row = (-betas).reshape(1, NB).astype(jnp.float32)

    # VMEM footprint of the pipelined blocks (last dim padded to 128 lanes,
    # second-last to 8 sublanes), double-buffered, with 2x headroom.
    def _blk_bytes(rows, cols, itemsize=4):
        return _round_up(rows, 8) * _round_up(cols, 128) * itemsize

    vmem_needed = 2 * (
        _blk_bytes(tile_e, 1)
        + _blk_bytes(tile_e, NB, jnp.dtype(out_dtype).itemsize)
        + 2 * _blk_bytes(1, NB)
    )
    vmem_limit = int(min(48 * 1024 * 1024, max(16 * 1024 * 1024, 2 * vmem_needed)))

    kernel = functools.partial(_exp_basis_kernel, scale=scale, offset=offset)

    out = pl.pallas_call(
        kernel,
        out_shape=jax.ShapeDtypeStruct((E_pad, NB), out_dtype),
        grid_spec=pltpu.PrefetchScalarGridSpec(
            num_scalar_prefetch=0,
            grid=(n_tiles,),
            in_specs=[
                pl.BlockSpec((tile_e, 1), lambda i: (i, 0)),   # dist column tile
                pl.BlockSpec((1, NB), lambda i: (0, 0)),        # means (resident)
                pl.BlockSpec((1, NB), lambda i: (0, 0)),        # -betas (resident)
            ],
            out_specs=pl.BlockSpec((tile_e, NB), lambda i: (i, 0)),
        ),
        compiler_params=pltpu.CompilerParams(
            dimension_semantics=("parallel",),   # shards edge tiles across v7x's 2 TCs
            vmem_limit_bytes=vmem_limit,
        ),
    )(dist_col, means_row, neg_betas_row)

    # TODO(synk): the ideal end-to-end path fuses the downstream num_rbf->hidden
    # filter matmul (contracting over NB, MXU currently idle) into this kernel so
    # the RBF tensor is never written to HBM; that crosses the module boundary,
    # so it is intentionally not done here.
    out = out[:E]
    return out.reshape(*orig_shape, NB)


def reference_exp_basis(dist, means, betas, alpha, cutoff_lower):
    """Plain-JAX reference mirroring the PyTorch forward exactly."""
    d = dist[..., None]
    return jnp.exp(-betas * (jnp.exp(alpha * (-d + cutoff_lower)) - means) ** 2)


if __name__ == "__main__":
    # Module defaults: cutoff_lower=0.0, cutoff_upper=5.0, num_rbf=50
    cutoff_lower = 0.0
    cutoff_upper = 5.0
    num_rbf = 50
    E = 1000  # not a multiple of the tile -> exercises padding and a 4-step grid

    # Deterministic parameter init matching ExpBasis._initial_params():
    start_value = math.exp(-(cutoff_upper - cutoff_lower))
    means = jnp.linspace(start_value, 1.0, num_rbf, dtype=jnp.float32)
    betas = jnp.full(
        (num_rbf,), (2.0 / num_rbf * (1.0 - start_value)) ** (-2), dtype=jnp.float32
    )
    alpha = 5.0 / (cutoff_upper - cutoff_lower)

    key = jax.random.PRNGKey(0)
    dist = jax.random.uniform(key, (E,), jnp.float32, cutoff_lower, cutoff_upper)

    out = exp_basis(
        dist, means, betas, cutoff_lower=cutoff_lower, cutoff_upper=cutoff_upper
    )
    out = jax.block_until_ready(out)

    ref = reference_exp_basis(dist, means, betas, alpha, cutoff_lower)
    assert out.shape == (E, num_rbf), out.shape
    assert out.dtype == dist.dtype, out.dtype
    assert jnp.allclose(out, ref, atol=1e-5, rtol=1e-4), "mismatch vs reference"

    print("KERNEL_OK")
</pallas_src>

<mosaic_0001>
module attributes {stable_mosaic.version = 11 : i64} {
  func.func @_exp_basis_kernel(%arg0: i32, %arg1: memref<256x1xf32, #tpu.memory_space<vmem>>, %arg2: memref<1x50xf32, #tpu.memory_space<vmem>>, %arg3: memref<1x50xf32, #tpu.memory_space<vmem>>, %arg4: memref<256x50xf32, #tpu.memory_space<vmem>>) attributes {dimension_semantics = [#tpu.dimension_semantics<parallel>], iteration_bounds = array<i64: 4>, scalar_prefetch = 0 : i64, scratch_operands = 0 : i64, tpu.core_type = #tpu.core_type<tc>, window_params = [{transform_indices = @transform_0, window_bounds = array<i64: 256, 1>}, {pipeline_mode = #tpu.pipeline_mode<synchronous>, transform_indices = @transform_1, window_bounds = array<i64: 1, 50>}, {pipeline_mode = #tpu.pipeline_mode<synchronous>, transform_indices = @transform_2, window_bounds = array<i64: 1, 50>}, {transform_indices = @transform_3, window_bounds = array<i64: 256, 50>}]} {
    %c0 = arith.constant 0 : index
    %c0_0 = arith.constant 0 : index
    %0 = vector.load %arg1[%c0, %c0_0] : memref<256x1xf32, #tpu.memory_space<vmem>>, vector<256x1xf32>
    %cst = arith.constant -1.000000e+00 : f32
    %1 = vector.broadcast %cst : f32 to vector<256x1xf32>
    %2 = arith.mulf %1, %0 : vector<256x1xf32>
    %cst_1 = arith.constant 0.000000e+00 : f32
    %3 = vector.broadcast %cst_1 : f32 to vector<256x1xf32>
    %4 = arith.addf %2, %3 : vector<256x1xf32>
    %5 = math.exp %4 : vector<256x1xf32>
    %c0_2 = arith.constant 0 : index
    %c0_3 = arith.constant 0 : index
    %6 = vector.load %arg2[%c0_2, %c0_3] : memref<1x50xf32, #tpu.memory_space<vmem>>, vector<1x50xf32>
    %7 = vector.broadcast %5 : vector<256x1xf32> to vector<256x50xf32>
    %8 = vector.broadcast %6 : vector<1x50xf32> to vector<256x50xf32>
    %9 = arith.subf %7, %8 : vector<256x50xf32>
    %c0_4 = arith.constant 0 : index
    %c0_5 = arith.constant 0 : index
    %10 = vector.load %arg3[%c0_4, %c0_5] : memref<1x50xf32, #tpu.memory_space<vmem>>, vector<1x50xf32>
    %11 = vector.broadcast %10 : vector<1x50xf32> to vector<256x50xf32>
    %12 = arith.mulf %11, %9 : vector<256x50xf32>
    %13 = arith.mulf %12, %9 : vector<256x50xf32>
    %14 = math.exp %13 : vector<256x50xf32>
    %c0_6 = arith.constant 0 : index
    %c0_7 = arith.constant 0 : index
    %15 = vector.load %arg4[%c0_6, %c0_7] : memref<256x50xf32, #tpu.memory_space<vmem>>, vector<256x50xf32>
    tpu.vector_store %arg4[%c0_6, %c0_7], %14 {strides = array<i32>} : memref<256x50xf32, #tpu.memory_space<vmem>>, vector<256x50xf32>,
    return
  }
  func.func @transform_0(%arg0: i32) -> (i32, i32) {
    %c0_i32 = arith.constant 0 : i32
    %c0_i32_0 = arith.constant 0 : i32
    return %arg0, %c0_i32 : i32, i32
  }
  func.func @transform_1(%arg0: i32) -> (i32, i32) {
    %c0_i32 = arith.constant 0 : i32
    %c0_i32_0 = arith.constant 0 : i32
    %c0_i32_1 = arith.constant 0 : i32
    return %c0_i32, %c0_i32_0 : i32, i32
  }
  func.func @transform_2(%arg0: i32) -> (i32, i32) {
    %c0_i32 = arith.constant 0 : i32
    %c0_i32_0 = arith.constant 0 : i32
    %c0_i32_1 = arith.constant 0 : i32
    return %c0_i32, %c0_i32_0 : i32, i32
  }
  func.func @transform_3(%arg0: i32) -> (i32, i32) {
    %c0_i32 = arith.constant 0 : i32
    %c0_i32_0 = arith.constant 0 : i32
    return %arg0, %c0_i32 : i32, i32
  }
}

</mosaic_0001>

<bundles_post_ra>
// kernel: tpu_custom_call.1
= control target key start
LH: loop header
LB: loop body
LE: loop exit
PB: predicated region body
PF: predicated region fallthrough
CT: control target
= control target key end

     0   :  { %s938_s12 = smov 0   ;;  %s1136_s0 = inlined_call_operand.vmem [shape: f32[1024,1], index: 0, kind: input, shape index: {}]   ;;  %s1137_s1 = inlined_call_operand.vmem [shape: f32[1,50], index: 1, kind: input, shape index: {}]   ;;  %s1138_s2 = inlined_call_operand.vmem [shape: f32[1,50], index: 2, kind: input, shape index: {}]   ;;  %s1139_s3 = inlined_call_operand.vmem [shape: f32[1024,50], index: 3, kind: output, shape index: {}]  }
   0x1 LB: > { %s757_s13 = sadd.s32 4294967295, %s915_s12   ;;  %p761_p0 = scmp.ge.s32.totalorder %s915_s12, 1  ;;  %s915_s12 = sphi %s938_s12, %s13_s12  }
   0x2   : > { %p138_p1 = scmp.lt.s32.totalorder %s915_s12, 5 }
   0x4   : > { %p139_p2 = pnand %p761_p0, %p138_p1 }
   0x5   : > { %s762_s14 = sshll.u32 (!%p139_p2), %s757_s13, 5  ;;  %v917_v0 = vmov (!%p139_p2), 0   ;;  %vm668_vm0 = vcmask (!%p139_p2), 408576  }
   0x6   : > { %142 = sbr.rel (%p139_p2) target bundleno = 241 (0xf1), region = 32  ;;  %780 = vset.pattern.permute.xlu1 (!%p139_p2), %v917_v0  ;;  %779 = vset.pattern.permute.xlu0 (!%p139_p2), %v917_v0  ;;  %p163_p3 = scmp.lt.s32.totalorder (!%p139_p2), %s762_s14, 127 }
   0xd   : > { %s1141_s14 = smov (!%p163_p3, %s762_s14), 127 }
   0xe   : > { %s763_s15 = sshll.u32 %s1141_s14, 3 }
   0xf   : > { %s954_s18 = scalar_lea.vmem %s1136_s0, %s763_s15  ;;  %s1019_s25 = scalar_lea.vmem %s1139_s3, %s763_s15 }
  0x10   : > { %v176_v1 = vld [vmem:[%s954_s18 + $0x10] sm:$0xff]  ;;  %v174_v2 = vld [vmem:[%s954_s18] sm:$0xff]  ;;  %v177_v3 = vld [vmem:[%s954_s18 + $0x18] sm:$0xff] }
  0x11   : > { %v208_v4 = vmul.f32 -1.0, %v176_v1  ;;  %v206_v5 = vmul.f32 -1.0, %v174_v2  ;;  %v209_v6 = vmul.f32 -1.0, %v177_v3  ;;  %v175_v7 = vld [vmem:[%s954_s18 + $0x8] sm:$0xff]  ;;  %v178_v9 = vld [vmem:[%s954_s18 + $0x20] sm:$0xff]  ;;  %v181_v17 = vld [vmem:[%s954_s18 + $0x38] sm:$0xff] }
  0x12   : > { %v179_v8 = vld [vmem:[%s954_s18 + $0x28] sm:$0xff]  ;;  %v207_v10 = vmul.f32 -1.0, %v175_v7  ;;  %v210_v16 = vmul.f32 -1.0, %v178_v9  ;;  %v180_v18 = vld [vmem:[%s954_s18 + $0x30] sm:$0xff]  ;;  %v213_v20 = vmul.f32 -1.0, %v181_v17  ;;  %v182_v24 = vld [vmem:[%s954_s18 + $0x40] sm:$0xff] }
  0x13   : > { %v211_v11 = vmul.f32 -1.0, %v179_v8  ;;  %v274_v12 = vmul.f32 1.442695, %v208_v4  ;;  %v270_v13 = vmul.f32 1.442695, %v206_v5  ;;  %v212_v22 = vmul.f32 -1.0, %v180_v18 }
  0x14   : > { %v276_v14 = vmul.f32 1.442695, %v209_v6  ;;  %v272_v15 = vmul.f32 1.442695, %v207_v10  ;;  %v278_v21 = vmul.f32 1.442695, %v210_v16 }
  0x15   : > { %781 = vpow2.f32 %v274_v12  ;;  %v280_v19 = vmul.f32 1.442695, %v211_v11  ;;  %v183_v23 = vld [vmem:[%s954_s18 + $0x48] sm:$0xff]  ;;  %v284_v25 = vmul.f32 1.442695, %v213_v20  ;;  %v214_v28 = vmul.f32 -1.0, %v182_v24 }
  0x16   : > { %783 = vpow2.f32 %v270_v13  ;;  %v215_v26 = vmul.f32 -1.0, %v183_v23  ;;  %v282_v27 = vmul.f32 1.442695, %v212_v22  ;;  %v185_v29 = vld [vmem:[%s954_s18 + $0x58] sm:$0xff]  ;;  %v184_v30 = vld [vmem:[%s954_s18 + $0x50] sm:$0xff]  ;;  %v187_v37 = vld [vmem:[%s954_s18 + $0x68] sm:$0xff] }
  0x17   : > { %785 = vpow2.f32 %v276_v14  ;;  %v217_v33 = vmul.f32 -1.0, %v185_v29  ;;  %v286_v35 = vmul.f32 1.442695, %v214_v28  ;;  %v216_v36 = vmul.f32 -1.0, %v184_v30  ;;  %v186_v39 = vld [vmem:[%s954_s18 + $0x60] sm:$0xff]  ;;  %v189_v45 = vld [vmem:[%s954_s18 + $0x78] sm:$0xff] }
  0x18   : > { %787 = vpow2.f32 %v272_v15  ;;  %v288_v32 = vmul.f32 1.442695, %v215_v26  ;;  %v219_v42 = vmul.f32 -1.0, %v187_v37  ;;  %v218_v44 = vmul.f32 -1.0, %v186_v39  ;;  %v188_v47 = vld [vmem:[%s954_s18 + $0x70] sm:$0xff]  ;;  %v191_v53 = vld [vmem:[%s954_s18 + $0x88] sm:$0xff] }
  0x19   : > { %789 = vpow2.f32 %v280_v19  ;;  %v292_v41 = vmul.f32 1.442695, %v217_v33  ;;  %v290_v43 = vmul.f32 1.442695, %v216_v36  ;;  %v221_v50 = vmul.f32 -1.0, %v189_v45  ;;  %v190_v55 = vld [vmem:[%s954_s18 + $0x80] sm:$0xff] }
  0x1a   : > { %791 = vpow2.f32 %v278_v21  ;;  %v296_v49 = vmul.f32 1.442695, %v219_v42  ;;  %v294_v51 = vmul.f32 1.442695, %v218_v44  ;;  %v220_v52 = vmul.f32 -1.0, %v188_v47  ;;  %v193_v61 = vld [vmem:[%s954_s18 + $0x98] sm:$0xff] }
  0x1b   : > { %793 = vpow2.f32 %v284_v25  ;;  %v300_v57 = vmul.f32 1.442695, %v221_v50  ;;  %v223_v58 = vmul.f32 -1.0, %v191_v53  ;;  %v222_v60 = vmul.f32 -1.0, %v190_v55  ;;  %v192_v63 = vld [vmem:[%s954_s18 + $0x90] sm:$0xff]  ;;  %v195_v5 = vld [vmem:[%s954_s18 + $0xa8] sm:$0xff] }
  0x1c   : > { %795 = vpow2.f32 %v282_v27  ;;  %v298_v59 = vmul.f32 1.442695, %v220_v52  ;;  %v225_v2 = vmul.f32 -1.0, %v193_v61  ;;  %v224_v4 = vmul.f32 -1.0, %v192_v63  ;;  %v194_v7 = vld [vmem:[%s954_s18 + $0xa0] sm:$0xff]  ;;  %v197_v13 = vld [vmem:[%s954_s18 + $0xb8] sm:$0xff] }
  0x1d   : > { %797 = vpow2.f32 %v288_v32  ;;  %v304_v1 = vmul.f32 1.442695, %v223_v58  ;;  %v302_v3 = vmul.f32 1.442695, %v222_v60  ;;  %v227_v10 = vmul.f32 -1.0, %v195_v5  ;;  %v196_v15 = vld [vmem:[%s954_s18 + $0xb0] sm:$0xff] }
  0x1e   : > { %799 = vpow2.f32 %v286_v35  ;;  %v308_v9 = vmul.f32 1.442695, %v225_v2  ;;  %v306_v11 = vmul.f32 1.442695, %v224_v4  ;;  %v226_v12 = vmul.f32 -1.0, %v194_v7  ;;  %v199_v21 = vld [vmem:[%s954_s18 + $0xc8] sm:$0xff] }
  0x1f   : > { %v782_v31 = vpop.eup %781  ;;  %801 = vpow2.f32 %v292_v41  ;;  %v312_v17 = vmul.f32 1.442695, %v227_v10  ;;  %v229_v18 = vmul.f32 -1.0, %v197_v13  ;;  %v228_v20 = vmul.f32 -1.0, %v196_v15  ;;  %v198_v23 = vld [vmem:[%s954_s18 + $0xc0] sm:$0xff]  ;;  %v201_v29 = vld [vmem:[%s954_s18 + $0xd8] sm:$0xff] }
  0x20   : > { %v784_v34 = vpop.eup %783  ;;  %347 = vperm.xlu1 %780, %v782_v31   ;;  %803 = vpow2.f32 %v290_v43  ;;  %v310_v19 = vmul.f32 1.442695, %v226_v12  ;;  %v231_v26 = vmul.f32 -1.0, %v199_v21  ;;  %v230_v28 = vmul.f32 -1.0, %v198_v23  ;;  %v200_v31 = vld [vmem:[%s954_s18 + $0xd0] sm:$0xff]  ;;  %v203_v37 = vld [vmem:[%s954_s18 + $0xe8] sm:$0xff] }
  0x21   : > { %v786_v38 = vpop.eup %785  ;;  %337 = vperm.xlu0 %779, %v784_v34   ;;  %805 = vpow2.f32 %v296_v49  ;;  %v316_v25 = vmul.f32 1.442695, %v229_v18  ;;  %v314_v27 = vmul.f32 1.442695, %v228_v20  ;;  %v233_v34 = vmul.f32 -1.0, %v201_v29  ;;  %v202_v39 = vld [vmem:[%s954_s18 + $0xe0] sm:$0xff] }
  0x22   : > { %v788_v40 = vpop.eup %787  ;;  %807 = vpow2.f32 %v294_v51  ;;  %v320_v33 = vmul.f32 1.442695, %v231_v26  ;;  %v318_v35 = vmul.f32 1.442695, %v230_v28  ;;  %v232_v36 = vmul.f32 -1.0, %v200_v31  ;;  %v205_v45 = vld [vmem:[%s954_s18 + $0xf8] sm:$0xff] }
  0x23   : > { %v790_v46 = vpop.eup %789  ;;  %809 = vpow2.f32 %v300_v57  ;;  %v324_v41 = vmul.f32 1.442695, %v233_v34  ;;  %v235_v42 = vmul.f32 -1.0, %v203_v37  ;;  %v234_v44 = vmul.f32 -1.0, %v202_v39  ;;  %v204_v47 = vld [vmem:[%s954_s18 + $0xf0] sm:$0xff] }
  0x24   : > { %352 = vperm.xlu1 %780, %v786_v38   ;;  %v792_v48 = vpop.eup %791  ;;  %811 = vpow2.f32 %v298_v59  ;;  %v322_v43 = vmul.f32 1.442695, %v232_v36  ;;  %v237_v50 = vmul.f32 -1.0, %v205_v45  ;;  %v236_v52 = vmul.f32 -1.0, %v204_v47  ;;  %v996_v2 = vld [vmem:[%s1138_s2] ss:$0 sm:$0xff] }
  0x25   : > { %342 = vperm.xlu0 %779, %v788_v40   ;;  %v794_v54 = vpop.eup %793  ;;  %813 = vpow2.f32 %v304_v1  ;;  %v328_v49 = vmul.f32 1.442695, %v235_v42  ;;  %v326_v51 = vmul.f32 1.442695, %v234_v44  ;;  %v991_v1 = vld [vmem:[%s1137_s1] ss:$0 sm:$0xff] }
  0x26   : > { %v796_v56 = vpop.eup %795  ;;  %815 = vpow2.f32 %v302_v3  ;;  %v332_v55 = vmul.f32 1.442695, %v237_v50 }
  0x27   : > { %v798_v62 = vpop.eup %797  ;;  %817 = vpow2.f32 %v308_v9 }
  0x28   : > { %362 = vperm.xlu1 %780, %v790_v46   ;;  %v800_v0 = vpop.eup %799  ;;  %819 = vpow2.f32 %v306_v11 }
  0x29   : > { %357 = vperm.xlu0 %779, %v792_v48   ;;  %v802_v6 = vpop.eup %801  ;;  %821 = vpow2.f32 %v312_v17 }
  0x2a   : > { %v804_v8 = vpop.eup %803  ;;  %823 = vpow2.f32 %v310_v19 }
  0x2b   : > { %v806_v14 = vpop.eup %805  ;;  %825 = vpow2.f32 %v316_v25 }
  0x2c   : > { %372 = vperm.xlu1 %780, %v794_v54   ;;  %v808_v16 = vpop.eup %807  ;;  %827 = vpow2.f32 %v314_v27 }
  0x2d   : > { %367 = vperm.xlu0 %779, %v796_v56   ;;  %v810_v22 = vpop.eup %809  ;;  %829 = vpow2.f32 %v320_v33  ;;  %v330_v56 = vmul.f32 1.442695, %v236_v52 }
  0x2e   : > { %v812_v24 = vpop.eup %811  ;;  %831 = vpow2.f32 %v318_v35 }
  0x2f   : > { %v814_v30 = vpop.eup %813  ;;  %833 = vpow2.f32 %v324_v41 }
  0x30   : > { %382 = vperm.xlu1 %780, %v798_v62   ;;  %v816_v32 = vpop.eup %815  ;;  %835 = vpow2.f32 %v322_v43 }
  0x31   : > { %377 = vperm.xlu0 %779, %v800_v0   ;;  %v818_v38 = vpop.eup %817  ;;  %837 = vpow2.f32 %v328_v49 }
  0x32   : > { %v820_v40 = vpop.eup %819  ;;  %839 = vpow2.f32 %v326_v51 }
  0x33   : > { %v822_v46 = vpop.eup %821  ;;  %841 = vpow2.f32 %v332_v55 }
  0x34   : > { %392 = vperm.xlu1 %780, %v802_v6   ;;  %v824_v48 = vpop.eup %823  ;;  %843 = vpow2.f32 %v330_v56 }
  0x35   : > { %387 = vperm.xlu0 %779, %v804_v8   ;;  %v826_v53 = vpop.eup %825 }
  0x36   : > { %v828_v54 = vpop.eup %827 }
  0x37   : > { %v830_v57 = vpop.eup %829 }
  0x38   : > { %402 = vperm.xlu1 %780, %v806_v14   ;;  %v832_v58 = vpop.eup %831 }
  0x39   : > { %397 = vperm.xlu0 %779, %v808_v16   ;;  %v834_v59 = vpop.eup %833 }
  0x3a   : > { %v836_v60 = vpop.eup %835 }
  0x3b   : > { %v838_v61 = vpop.eup %837 }
  0x3c   : > { %412 = vperm.xlu1 %780, %v810_v22   ;;  %v840_v62 = vpop.eup %839 }
  0x3d   : > { %407 = vperm.xlu0 %779, %v812_v24   ;;  %v842_v63 = vpop.eup %841 }
  0x3e   : > { %v844_v0 = vpop.eup %843 }
  0x40   : > { %422 = vperm.xlu1 %780, %v814_v30  }
  0x41   : > { %417 = vperm.xlu0 %779, %v816_v32  }
  0x44   : > { %432 = vperm.xlu1 %780, %v818_v38  }
  0x45   : > { %427 = vperm.xlu0 %779, %v820_v40  }
  0x48   : > { %442 = vperm.xlu1 %780, %v822_v46  }
  0x49   : > { %437 = vperm.xlu0 %779, %v824_v48  }
  0x4c   : > { %452 = vperm.xlu1 %780, %v826_v53  }
  0x4d   : > { %447 = vperm.xlu0 %779, %v828_v54  }
  0x50   : > { %462 = vperm.xlu1 %780, %v830_v57  }
  0x51   : > { %457 = vperm.xlu0 %779, %v832_v58  }
  0x54   : > { %472 = vperm.xlu1 %780, %v834_v59  }
  0x55   : > { %467 = vperm.xlu0 %779, %v836_v60  }
  0x58   : > { %482 = vperm.xlu1 %780, %v838_v61  }
  0x59   : > { %477 = vperm.xlu0 %779, %v840_v62  }
  0x5c   : > { %492 = vperm.xlu1 %780, %v842_v63  }
  0x5d   : > { %487 = vperm.xlu0 %779, %v844_v0  }
  0x9f   : > { %v348_v3 = vpop.permute.xlu1 %347 }
  0xa0   : > { %v503_v4 = vsub.f32 %v348_v3, %v991_v1  ;;  %v338_v5 = vpop.permute.xlu0 %337 }
  0xa1   : > { %v501_v6 = vsub.f32 %v338_v5, %v991_v1 }
  0xa2   : > { %v542_v7 = vmul.f32 %v996_v2, %v503_v4 }
  0xa3   : > { %v540_v8 = vmul.f32 %v996_v2, %v501_v6  ;;  %v353_v9 = vpop.permute.xlu1 %352 }
  0xa4   : > { %v574_v10 = vmul.f32 %v542_v7, %v503_v4  ;;  %v504_v11 = vsub.f32 %v353_v9, %v991_v1  ;;  %v343_v12 = vpop.permute.xlu0 %342 }
  0xa5   : > { %v572_v13 = vmul.f32 %v540_v8, %v501_v6  ;;  %v502_v14 = vsub.f32 %v343_v12, %v991_v1 }
  0xa6   : > { %v608_v15 = vmul.f32 1.442695, %v574_v10  ;;  %v543_v16 = vmul.f32 %v996_v2, %v504_v11 }
  0xa7   : > { %v604_v17 = vmul.f32 1.442695, %v572_v13  ;;  %v541_v18 = vmul.f32 %v996_v2, %v502_v14  ;;  %v363_v19 = vpop.permute.xlu1 %362 }
  0xa8   : > { %845 = vpow2.f32 %v608_v15  ;;  %v575_v20 = vmul.f32 %v543_v16, %v504_v11  ;;  %v506_v21 = vsub.f32 %v363_v19, %v991_v1  ;;  %v358_v22 = vpop.permute.xlu0 %357 }
  0xa9   : > { %847 = vpow2.f32 %v604_v17  ;;  %v573_v23 = vmul.f32 %v541_v18, %v502_v14  ;;  %v505_v24 = vsub.f32 %v358_v22, %v991_v1 }
  0xaa   : > { %v610_v25 = vmul.f32 1.442695, %v575_v20  ;;  %v545_v26 = vmul.f32 %v996_v2, %v506_v21 }
  0xab   : > { %v606_v27 = vmul.f32 1.442695, %v573_v23  ;;  %v544_v28 = vmul.f32 %v996_v2, %v505_v24  ;;  %v373_v29 = vpop.permute.xlu1 %372 }
  0xac   : > { %849 = vpow2.f32 %v610_v25  ;;  %v577_v30 = vmul.f32 %v545_v26, %v506_v21  ;;  %v508_v31 = vsub.f32 %v373_v29, %v991_v1  ;;  %v368_v32 = vpop.permute.xlu0 %367 }
  0xad   : > { %851 = vpow2.f32 %v606_v27  ;;  %v576_v33 = vmul.f32 %v544_v28, %v505_v24  ;;  %v507_v34 = vsub.f32 %v368_v32, %v991_v1 }
  0xae   : > { %v614_v35 = vmul.f32 1.442695, %v577_v30  ;;  %v547_v36 = vmul.f32 %v996_v2, %v508_v31 }
  0xaf   : > { %v612_v37 = vmul.f32 1.442695, %v576_v33  ;;  %v546_v38 = vmul.f32 %v996_v2, %v507_v34  ;;  %v383_v39 = vpop.permute.xlu1 %382 }
  0xb0   : > { %853 = vpow2.f32 %v614_v35  ;;  %v579_v40 = vmul.f32 %v547_v36, %v508_v31  ;;  %v510_v41 = vsub.f32 %v383_v39, %v991_v1  ;;  %v378_v42 = vpop.permute.xlu0 %377 }
  0xb1   : > { %855 = vpow2.f32 %v612_v37  ;;  %v578_v43 = vmul.f32 %v546_v38, %v507_v34  ;;  %v509_v44 = vsub.f32 %v378_v42, %v991_v1 }
  0xb2   : > { %v846_v45 = vpop.eup %845  ;;  %v618_v46 = vmul.f32 1.442695, %v579_v40  ;;  %v549_v47 = vmul.f32 %v996_v2, %v510_v41 }
  0xb3   : > { %v848_v48 = vpop.eup %847  ;;  %671 = vst.msk [vmem:[%s1019_s25 + $0x10] sm:$0xff] %vm668_vm0, %v846_v45  ;;  %v616_v49 = vmul.f32 1.442695, %v578_v43  ;;  %v548_v50 = vmul.f32 %v996_v2, %v509_v44  ;;  %v393_v51 = vpop.permute.xlu1 %392 }
  0xb4   : > { %669 = vst.msk [vmem:[%s1019_s25] sm:$0xff] %vm668_vm0, %v848_v48  ;;  %857 = vpow2.f32 %v618_v46  ;;  %v581_v52 = vmul.f32 %v549_v47, %v510_v41  ;;  %v512_v53 = vsub.f32 %v393_v51, %v991_v1  ;;  %v388_v54 = vpop.permute.xlu0 %387 }
  0xb5   : > { %859 = vpow2.f32 %v616_v49  ;;  %v580_v55 = vmul.f32 %v548_v50, %v509_v44  ;;  %v511_v56 = vsub.f32 %v388_v54, %v991_v1 }
  0xb6   : > { %v850_v57 = vpop.eup %849  ;;  %v622_v58 = vmul.f32 1.442695, %v581_v52  ;;  %v551_v59 = vmul.f32 %v996_v2, %v512_v53 }
  0xb7   : > { %v852_v60 = vpop.eup %851  ;;  %672 = vst.msk [vmem:[%s1019_s25 + $0x18] sm:$0xff] %vm668_vm0, %v850_v57  ;;  %v620_v61 = vmul.f32 1.442695, %v580_v55  ;;  %v550_v62 = vmul.f32 %v996_v2, %v511_v56  ;;  %v403_v63 = vpop.permute.xlu1 %402 }
  0xb8   : > { %670 = vst.msk [vmem:[%s1019_s25 + $0x8] sm:$0xff] %vm668_vm0, %v852_v60  ;;  %861 = vpow2.f32 %v622_v58  ;;  %v583_v0 = vmul.f32 %v551_v59, %v512_v53  ;;  %v514_v3 = vsub.f32 %v403_v63, %v991_v1  ;;  %v398_v4 = vpop.permute.xlu0 %397 }
  0xb9   : > { %863 = vpow2.f32 %v620_v61  ;;  %v582_v5 = vmul.f32 %v550_v62, %v511_v56  ;;  %v513_v6 = vsub.f32 %v398_v4, %v991_v1 }
  0xba   : > { %v854_v7 = vpop.eup %853  ;;  %v626_v8 = vmul.f32 1.442695, %v583_v0  ;;  %v553_v9 = vmul.f32 %v996_v2, %v514_v3 }
  0xbb   : > { %v856_v10 = vpop.eup %855  ;;  %674 = vst.msk [vmem:[%s1019_s25 + $0x28] sm:$0xff] %vm668_vm0, %v854_v7  ;;  %v624_v11 = vmul.f32 1.442695, %v582_v5  ;;  %v552_v12 = vmul.f32 %v996_v2, %v513_v6  ;;  %v413_v13 = vpop.permute.xlu1 %412 }
  0xbc   : > { %673 = vst.msk [vmem:[%s1019_s25 + $0x20] sm:$0xff] %vm668_vm0, %v856_v10  ;;  %865 = vpow2.f32 %v626_v8  ;;  %v585_v14 = vmul.f32 %v553_v9, %v514_v3  ;;  %v516_v15 = vsub.f32 %v413_v13, %v991_v1  ;;  %v408_v16 = vpop.permute.xlu0 %407 }
  0xbd   : > { %867 = vpow2.f32 %v624_v11  ;;  %v584_v17 = vmul.f32 %v552_v12, %v513_v6  ;;  %v515_v18 = vsub.f32 %v408_v16, %v991_v1 }
  0xbe   : > { %v858_v19 = vpop.eup %857  ;;  %v630_v20 = vmul.f32 1.442695, %v585_v14  ;;  %v555_v21 = vmul.f32 %v996_v2, %v516_v15 }
  0xbf   : > { %v860_v22 = vpop.eup %859  ;;  %676 = vst.msk [vmem:[%s1019_s25 + $0x38] sm:$0xff] %vm668_vm0, %v858_v19  ;;  %v628_v23 = vmul.f32 1.442695, %v584_v17  ;;  %v554_v24 = vmul.f32 %v996_v2, %v515_v18  ;;  %v423_v25 = vpop.permute.xlu1 %422 }
  0xc0   : > { %675 = vst.msk [vmem:[%s1019_s25 + $0x30] sm:$0xff] %vm668_vm0, %v860_v22  ;;  %869 = vpow2.f32 %v630_v20  ;;  %v587_v26 = vmul.f32 %v555_v21, %v516_v15  ;;  %v518_v27 = vsub.f32 %v423_v25, %v991_v1  ;;  %v418_v28 = vpop.permute.xlu0 %417 }
  0xc1   : > { %871 = vpow2.f32 %v628_v23  ;;  %v586_v29 = vmul.f32 %v554_v24, %v515_v18  ;;  %v517_v30 = vsub.f32 %v418_v28, %v991_v1 }
  0xc2   : > { %v862_v31 = vpop.eup %861  ;;  %v634_v32 = vmul.f32 1.442695, %v587_v26  ;;  %v557_v33 = vmul.f32 %v996_v2, %v518_v27 }
  0xc3   : > { %v864_v34 = vpop.eup %863  ;;  %678 = vst.msk [vmem:[%s1019_s25 + $0x48] sm:$0xff] %vm668_vm0, %v862_v31  ;;  %v632_v35 = vmul.f32 1.442695, %v586_v29  ;;  %v556_v36 = vmul.f32 %v996_v2, %v517_v30  ;;  %v433_v37 = vpop.permute.xlu1 %432 }
  0xc4   : > { %677 = vst.msk [vmem:[%s1019_s25 + $0x40] sm:$0xff] %vm668_vm0, %v864_v34  ;;  %873 = vpow2.f32 %v634_v32  ;;  %v589_v38 = vmul.f32 %v557_v33, %v518_v27  ;;  %v520_v39 = vsub.f32 %v433_v37, %v991_v1  ;;  %v428_v40 = vpop.permute.xlu0 %427 }
  0xc5   : > { %875 = vpow2.f32 %v632_v35  ;;  %v588_v41 = vmul.f32 %v556_v36, %v517_v30  ;;  %v519_v42 = vsub.f32 %v428_v40, %v991_v1 }
  0xc6   : > { %v866_v43 = vpop.eup %865  ;;  %v638_v44 = vmul.f32 1.442695, %v589_v38  ;;  %v559_v45 = vmul.f32 %v996_v2, %v520_v39 }
  0xc7   : > { %v868_v46 = vpop.eup %867  ;;  %680 = vst.msk [vmem:[%s1019_s25 + $0x58] sm:$0xff] %vm668_vm0, %v866_v43  ;;  %v636_v47 = vmul.f32 1.442695, %v588_v41  ;;  %v558_v48 = vmul.f32 %v996_v2, %v519_v42  ;;  %v443_v49 = vpop.permute.xlu1 %442 }
  0xc8   : > { %679 = vst.msk [vmem:[%s1019_s25 + $0x50] sm:$0xff] %vm668_vm0, %v868_v46  ;;  %877 = vpow2.f32 %v638_v44  ;;  %v591_v50 = vmul.f32 %v559_v45, %v520_v39  ;;  %v522_v51 = vsub.f32 %v443_v49, %v991_v1  ;;  %v438_v52 = vpop.permute.xlu0 %437 }
  0xc9   : > { %879 = vpow2.f32 %v636_v47  ;;  %v590_v53 = vmul.f32 %v558_v48, %v519_v42  ;;  %v521_v54 = vsub.f32 %v438_v52, %v991_v1 }
  0xca   : > { %v870_v55 = vpop.eup %869  ;;  %v642_v56 = vmul.f32 1.442695, %v591_v50  ;;  %v561_v57 = vmul.f32 %v996_v2, %v522_v51 }
  0xcb   : > { %v872_v58 = vpop.eup %871  ;;  %682 = vst.msk [vmem:[%s1019_s25 + $0x68] sm:$0xff] %vm668_vm0, %v870_v55  ;;  %v640_v59 = vmul.f32 1.442695, %v590_v53  ;;  %v560_v60 = vmul.f32 %v996_v2, %v521_v54  ;;  %v453_v61 = vpop.permute.xlu1 %452 }
  0xcc   : > { %681 = vst.msk [vmem:[%s1019_s25 + $0x60] sm:$0xff] %vm668_vm0, %v872_v58  ;;  %881 = vpow2.f32 %v642_v56  ;;  %v593_v62 = vmul.f32 %v561_v57, %v522_v51  ;;  %v524_v63 = vsub.f32 %v453_v61, %v991_v1  ;;  %v448_v0 = vpop.permute.xlu0 %447 }
  0xcd   : > { %883 = vpow2.f32 %v640_v59  ;;  %v592_v3 = vmul.f32 %v560_v60, %v521_v54  ;;  %v523_v4 = vsub.f32 %v448_v0, %v991_v1 }
  0xce   : > { %v874_v5 = vpop.eup %873  ;;  %v646_v6 = vmul.f32 1.442695, %v593_v62  ;;  %v563_v7 = vmul.f32 %v996_v2, %v524_v63 }
  0xcf   : > { %v876_v8 = vpop.eup %875  ;;  %684 = vst.msk [vmem:[%s1019_s25 + $0x78] sm:$0xff] %vm668_vm0, %v874_v5  ;;  %v644_v9 = vmul.f32 1.442695, %v592_v3  ;;  %v562_v10 = vmul.f32 %v996_v2, %v523_v4  ;;  %v463_v11 = vpop.permute.xlu1 %462 }
  0xd0   : > { %683 = vst.msk [vmem:[%s1019_s25 + $0x70] sm:$0xff] %vm668_vm0, %v876_v8  ;;  %885 = vpow2.f32 %v646_v6  ;;  %v595_v12 = vmul.f32 %v563_v7, %v524_v63  ;;  %v526_v13 = vsub.f32 %v463_v11, %v991_v1  ;;  %v458_v14 = vpop.permute.xlu0 %457 }
  0xd1   : > { %887 = vpow2.f32 %v644_v9  ;;  %v594_v15 = vmul.f32 %v562_v10, %v523_v4  ;;  %v525_v16 = vsub.f32 %v458_v14, %v991_v1 }
  0xd2   : > { %v878_v17 = vpop.eup %877  ;;  %v650_v18 = vmul.f32 1.442695, %v595_v12  ;;  %v565_v19 = vmul.f32 %v996_v2, %v526_v13 }
  0xd3   : > { %v880_v20 = vpop.eup %879  ;;  %686 = vst.msk [vmem:[%s1019_s25 + $0x88] sm:$0xff] %vm668_vm0, %v878_v17  ;;  %v648_v21 = vmul.f32 1.442695, %v594_v15  ;;  %v564_v22 = vmul.f32 %v996_v2, %v525_v16  ;;  %v473_v23 = vpop.permute.xlu1 %472 }
  0xd4   : > { %685 = vst.msk [vmem:[%s1019_s25 + $0x80] sm:$0xff] %vm668_vm0, %v880_v20  ;;  %889 = vpow2.f32 %v650_v18  ;;  %v597_v24 = vmul.f32 %v565_v19, %v526_v13  ;;  %v528_v25 = vsub.f32 %v473_v23, %v991_v1  ;;  %v468_v26 = vpop.permute.xlu0 %467 }
  0xd5   : > { %891 = vpow2.f32 %v648_v21  ;;  %v596_v27 = vmul.f32 %v564_v22, %v525_v16  ;;  %v527_v28 = vsub.f32 %v468_v26, %v991_v1 }
  0xd6   : > { %v882_v29 = vpop.eup %881  ;;  %v654_v30 = vmul.f32 1.442695, %v597_v24  ;;  %v567_v31 = vmul.f32 %v996_v2, %v528_v25 }
  0xd7   : > { %v884_v32 = vpop.eup %883  ;;  %688 = vst.msk [vmem:[%s1019_s25 + $0x98] sm:$0xff] %vm668_vm0, %v882_v29  ;;  %v652_v33 = vmul.f32 1.442695, %v596_v27  ;;  %v566_v34 = vmul.f32 %v996_v2, %v527_v28  ;;  %v483_v35 = vpop.permute.xlu1 %482 }
  0xd8   : > { %687 = vst.msk [vmem:[%s1019_s25 + $0x90] sm:$0xff] %vm668_vm0, %v884_v32  ;;  %893 = vpow2.f32 %v654_v30  ;;  %v599_v36 = vmul.f32 %v567_v31, %v528_v25  ;;  %v530_v37 = vsub.f32 %v483_v35, %v991_v1  ;;  %v478_v38 = vpop.permute.xlu0 %477 }
  0xd9   : > { %895 = vpow2.f32 %v652_v33  ;;  %v598_v39 = vmul.f32 %v566_v34, %v527_v28  ;;  %v529_v40 = vsub.f32 %v478_v38, %v991_v1 }
  0xda   : > { %v886_v41 = vpop.eup %885  ;;  %v658_v42 = vmul.f32 1.442695, %v599_v36  ;;  %v569_v43 = vmul.f32 %v996_v2, %v530_v37 }
  0xdb   : > { %v888_v44 = vpop.eup %887  ;;  %690 = vst.msk [vmem:[%s1019_s25 + $0xa8] sm:$0xff] %vm668_vm0, %v886_v41  ;;  %v656_v45 = vmul.f32 1.442695, %v598_v39  ;;  %v568_v46 = vmul.f32 %v996_v2, %v529_v40  ;;  %v493_v47 = vpop.permute.xlu1 %492 }
  0xdc   : > { %689 = vst.msk [vmem:[%s1019_s25 + $0xa0] sm:$0xff] %vm668_vm0, %v888_v44  ;;  %897 = vpow2.f32 %v658_v42  ;;  %v601_v48 = vmul.f32 %v569_v43, %v530_v37  ;;  %v532_v49 = vsub.f32 %v493_v47, %v991_v1  ;;  %v488_v50 = vpop.permute.xlu0 %487 }
  0xdd   : > { %899 = vpow2.f32 %v656_v45  ;;  %v600_v51 = vmul.f32 %v568_v46, %v529_v40  ;;  %v531_v52 = vsub.f32 %v488_v50, %v991_v1 }
  0xde   : > { %v890_v53 = vpop.eup %889  ;;  %v662_v54 = vmul.f32 1.442695, %v601_v48  ;;  %v571_v55 = vmul.f32 %v996_v2, %v532_v49 }
  0xdf   : > { %v892_v56 = vpop.eup %891  ;;  %692 = vst.msk [vmem:[%s1019_s25 + $0xb8] sm:$0xff] %vm668_vm0, %v890_v53  ;;  %v660_v57 = vmul.f32 1.442695, %v600_v51  ;;  %v570_v58 = vmul.f32 %v996_v2, %v531_v52 }
  0xe0   : > { %691 = vst.msk [vmem:[%s1019_s25 + $0xb0] sm:$0xff] %vm668_vm0, %v892_v56  ;;  %901 = vpow2.f32 %v662_v54  ;;  %v603_v59 = vmul.f32 %v571_v55, %v532_v49 }
  0xe1   : > { %903 = vpow2.f32 %v660_v57  ;;  %v602_v1 = vmul.f32 %v570_v58, %v531_v52 }
  0xe2   : > { %v894_v60 = vpop.eup %893  ;;  %v666_v61 = vmul.f32 1.442695, %v603_v59 }
  0xe3   : > { %v896_v62 = vpop.eup %895  ;;  %694 = vst.msk [vmem:[%s1019_s25 + $0xc8] sm:$0xff] %vm668_vm0, %v894_v60  ;;  %v664_v63 = vmul.f32 1.442695, %v602_v1 }
  0xe4   : > { %693 = vst.msk [vmem:[%s1019_s25 + $0xc0] sm:$0xff] %vm668_vm0, %v896_v62  ;;  %905 = vpow2.f32 %v666_v61 }
  0xe5   : > { %907 = vpow2.f32 %v664_v63 }
  0xe6   : > { %v898_v2 = vpop.eup %897 }
  0xe7   : > { %v900_v0 = vpop.eup %899  ;;  %696 = vst.msk [vmem:[%s1019_s25 + $0xd8] sm:$0xff] %vm668_vm0, %v898_v2 }
  0xe8   : > { %695 = vst.msk [vmem:[%s1019_s25 + $0xd0] sm:$0xff] %vm668_vm0, %v900_v0 }
  0xea   : > { %v902_v3 = vpop.eup %901 }
  0xeb   : > { %v904_v4 = vpop.eup %903  ;;  %698 = vst.msk [vmem:[%s1019_s25 + $0xe8] sm:$0xff] %vm668_vm0, %v902_v3 }
  0xec   : > { %697 = vst.msk [vmem:[%s1019_s25 + $0xe0] sm:$0xff] %vm668_vm0, %v904_v4 }
  0xee   : > { %v906_v5 = vpop.eup %905 }
  0xef   : > { %v908_v6 = vpop.eup %907  ;;  %700 = vst.msk [vmem:[%s1019_s25 + $0xf8] sm:$0xff] %vm668_vm0, %v906_v5 }
  0xf0   : > { %699 = vst.msk [vmem:[%s1019_s25 + $0xf0] sm:$0xff] %vm668_vm0, %v908_v6 }
  0xf1 PF: > { %s13_s12 = sadd.s32 1, %s915_s12  }
  0xf2   : > { %p10_p4 = scmp.ge.s32.totalorder %s13_s12, 6  }
  0xf4   :  { %12 = sbr.rel (!%p10_p4) target bundleno = 1 (0x1), region = 62 }

</bundles_post_ra>
